<compile_context>
chip_gen: v7x
topology: tpu7x:2x2x1
jax: 0.10.0
libtpu: 0.0.40
codegen_flags: <defaults>
</compile_context>

<pallas_src>
import functools

import jax
import jax.numpy as jnp
from jax.experimental import pallas as pl
from jax.experimental.pallas import tpu as pltpu

NUM_CLASSES = 10
BN_EPS = 1e-5
LANE = 128
_VMEM_LIMIT = 48 * 1024 * 1024  # <= v7x 64 MiB physical VMEM

_CP_MM = pltpu.CompilerParams(
    dimension_semantics=("parallel", "parallel", "arbitrary"),
    vmem_limit_bytes=_VMEM_LIMIT,
)
_CP_POOL = pltpu.CompilerParams(
    dimension_semantics=("parallel",),
    vmem_limit_bytes=_VMEM_LIMIT,
)
_CP_HEAD = pltpu.CompilerParams(vmem_limit_bytes=_VMEM_LIMIT)


# ----------------------------- Pallas kernels ------------------------------

def _mm_kernel(a_ref, b_ref, bias_ref, *rest, relu, has_res):
    """Tiled matmul: acc += a@b over K grid axis; epilogue bias(+res)(+ReLU)."""
    if has_res:
        res_ref, o_ref, acc_ref = rest
    else:
        o_ref, acc_ref = rest

    @pl.when(pl.program_id(2) == 0)
    def _():
        acc_ref[...] = jnp.zeros_like(acc_ref)

    acc_ref[...] += jnp.dot(a_ref[...], b_ref[...],
                            preferred_element_type=jnp.float32)

    @pl.when(pl.program_id(2) == pl.num_programs(2) - 1)
    def _():
        out = acc_ref[...] + bias_ref[...]
        if has_res:
            out = out + res_ref[...].astype(jnp.float32)
        if relu:
            out = jnp.maximum(out, 0.0)
        o_ref[...] = out.astype(o_ref.dtype)


def _pick_tile(dim, cands=(256, 128)):
    for c in cands:
        if dim % c == 0:
            return c
    return dim  # full dim (always a legal block size)


def matmul_bias(a, b, bias, *, relu, residual=None, out_dtype=jnp.bfloat16):
    """(M,K)@(K,N) + bias[N] (+ residual[M,N]) (+ ReLU), bf16 MXU / f32 acc."""
    M, K = a.shape
    K2, N = b.shape
    assert K == K2
    tm = _pick_tile(M)
    tn = _pick_tile(N)
    tk = _pick_tile(K)
    grid = (M // tm, N // tn, K // tk)

    in_specs = [
        pl.BlockSpec((tm, tk), lambda i, j, k: (i, k)),
        pl.BlockSpec((tk, tn), lambda i, j, k: (k, j)),
        pl.BlockSpec((1, tn), lambda i, j, k: (0, j)),
    ]
    args = [a.astype(jnp.bfloat16), b.astype(jnp.bfloat16),
            bias.reshape(1, N).astype(jnp.float32)]
    if residual is not None:
        in_specs.append(pl.BlockSpec((tm, tn), lambda i, j, k: (i, j)))
        args.append(residual)

    kernel = functools.partial(_mm_kernel, relu=relu,
                               has_res=residual is not None)
    return pl.pallas_call(
        kernel,
        out_shape=jax.ShapeDtypeStruct((M, N), out_dtype),
        grid=grid,
        in_specs=in_specs,
        out_specs=pl.BlockSpec((tm, tn), lambda i, j, k: (i, j)),
        scratch_shapes=[pltpu.VMEM((tm, tn), jnp.float32)],
        compiler_params=_CP_MM,
    )(*args)


def _maxpool_kernel(x_ref, o_ref, *, Ho, Wo):
    """3x3/s2 max over a parity-split map: 9 contiguous-slice loads, running max."""
    m = None
    for i in range(3):
        pi, si = i % 2, i // 2
        for j in range(3):
            pj, sj = j % 2, j // 2
            v = x_ref[0, pi, pj, pl.ds(si, Ho), pl.ds(sj, Wo), :]
            m = v if m is None else jnp.maximum(m, v)
    o_ref[0] = m.astype(o_ref.dtype)


def maxpool_3x3_s2_p1(x):
    N, H, W, C = x.shape
    xp = jnp.pad(x, ((0, 0), (1, 1), (1, 1), (0, 0)), constant_values=-jnp.inf)
    Hp, Wp = H + 2, W + 2
    Ho = (H + 2 - 3) // 2 + 1
    Wo = (W + 2 - 3) // 2 + 1
    # Split H/W into (half, parity) and move parities to the front so every one
    # of the 9 shifted windows is a plain contiguous slice in the kernel.
    xr = xp.reshape(N, Hp // 2, 2, Wp // 2, 2, C).transpose(0, 2, 4, 1, 3, 5)
    out = pl.pallas_call(
        functools.partial(_maxpool_kernel, Ho=Ho, Wo=Wo),
        out_shape=jax.ShapeDtypeStruct((N, Ho, Wo, C), x.dtype),
        grid=(N,),
        in_specs=[pl.BlockSpec((1, 2, 2, Hp // 2, Wp // 2, C),
                               lambda n: (n, 0, 0, 0, 0, 0))],
        out_specs=pl.BlockSpec((1, Ho, Wo, C), lambda n: (n, 0, 0, 0)),
        compiler_params=_CP_POOL,
    )(xr)
    return out


def _head_kernel(x_ref, w_ref, b_ref, o_ref):
    """Fused global-average-pool + Linear head (single call, lane-dense out)."""
    feat = jnp.mean(x_ref[...].astype(jnp.float32), axis=1)          # (N, C)
    acc = jnp.dot(feat.astype(jnp.bfloat16), w_ref[...],
                  preferred_element_type=jnp.float32)
    o_ref[...] = (acc + b_ref[...]).astype(o_ref.dtype)


def avgpool_fc(x, fc_w, fc_b):
    N, H, W, C = x.shape
    Np = fc_w.shape[1]
    xr = x.reshape(N, H * W, C)
    return pl.pallas_call(
        _head_kernel,
        out_shape=jax.ShapeDtypeStruct((N, Np), jnp.float32),
        grid=(1,),
        in_specs=[pl.BlockSpec((N, H * W, C), lambda i: (0, 0, 0)),
                  pl.BlockSpec((C, Np), lambda i: (0, 0)),
                  pl.BlockSpec((1, Np), lambda i: (0, 0))],
        out_specs=pl.BlockSpec((N, Np), lambda i: (0, 0)),
        compiler_params=_CP_HEAD,
    )(xr, fc_w, fc_b.reshape(1, Np))


# ------------------------------ JAX glue ops --------------------------------

def _im2col(x, kh, kw, stride, pad):
    """x: (N,H,W,C) bf16 -> patches (N*Ho*Wo, kh*kw*C) bf16."""
    N, H, W, C = x.shape
    xp = jnp.pad(x, ((0, 0), (pad, pad), (pad, pad), (0, 0)))
    Ho = (H + 2 * pad - kh) // stride + 1
    Wo = (W + 2 * pad - kw) // stride + 1
    cols = []
    for i in range(kh):
        for j in range(kw):
            cols.append(xp[:, i:i + stride * Ho:stride, j:j + stride * Wo:stride, :])
    patches = jnp.stack(cols, axis=3)  # (N, Ho, Wo, kh*kw, C)
    return patches.reshape(N * Ho * Wo, kh * kw * C), Ho, Wo


def conv_bn(x, p, *, stride, pad, relu, residual=None):
    """Conv2d + folded BatchNorm (+ fused residual/ReLU) via Pallas matmul."""
    N = x.shape[0]
    kh, kw = p["kh"], p["kw"]
    if kh == 1 and kw == 1 and pad == 0:
        if stride > 1:
            x = x[:, ::stride, ::stride, :]
        _, Ho, Wo, C = x.shape
        patches = x.reshape(N * Ho * Wo, C)
    else:
        patches, Ho, Wo = _im2col(x, kh, kw, stride, pad)
    K = p["w"].shape[0]
    if patches.shape[1] != K:  # stem: K zero-padded to a multiple of 8
        patches = jnp.pad(patches, ((0, 0), (0, K - patches.shape[1])))
    out = matmul_bias(patches, p["w"], p["b"], relu=relu, residual=residual)
    return out.reshape(N, Ho, Wo, p["w"].shape[1])


# --------------------------- Parameter construction -------------------------

class _KeyGen:
    def __init__(self, seed):
        self._key = jax.random.PRNGKey(seed)

    def __call__(self):
        self._key, sub = jax.random.split(self._key)
        return sub


def _fold_bn(w2d, gamma, beta, mean, var):
    scale = gamma / jnp.sqrt(var + BN_EPS)
    return w2d * scale[None, :], beta - mean * scale


def _init_conv_bn(kg, kh, kw, cin, cout):
    fan_in = kh * kw * cin
    w = jax.random.normal(kg(), (kh, kw, cin, cout), jnp.float32) / jnp.sqrt(float(fan_in))
    gamma = jax.random.uniform(kg(), (cout,), jnp.float32, 0.5, 1.5)
    beta = 0.1 * jax.random.normal(kg(), (cout,), jnp.float32)
    mean = 0.1 * jax.random.normal(kg(), (cout,), jnp.float32)
    var = jax.random.uniform(kg(), (cout,), jnp.float32, 0.5, 1.5)
    wf, bf = _fold_bn(w.reshape(fan_in, cout), gamma, beta, mean, var)
    k_pad = (-fan_in) % 8  # align K (stem: 147 -> 152), zero rows are exact
    if k_pad:
        wf = jnp.pad(wf, ((0, k_pad), (0, 0)))
    return {"w": wf.astype(jnp.bfloat16), "b": bf, "kh": kh, "kw": kw}


def _make_layer(kg, inplanes, planes, blocks, stride):
    layer = []
    for i in range(blocks):
        s = stride if i == 0 else 1
        need_down = (s != 1) or (inplanes != planes * 4)
        blk = {
            "conv1": _init_conv_bn(kg, 1, 1, inplanes, planes),
            "conv2": _init_conv_bn(kg, 3, 3, planes, planes),
            "conv3": _init_conv_bn(kg, 1, 1, planes, planes * 4),
            "down": _init_conv_bn(kg, 1, 1, inplanes, planes * 4) if need_down else None,
            "stride": s,
        }
        layer.append(blk)
        inplanes = planes * 4
    return layer, inplanes


def init_resnet50_params(seed, num_classes):
    # TODO(synk): pretrained torchvision weights not loadable in-script; random
    #             BN-folded weights are used (same compute graph / shapes).
    kg = _KeyGen(seed)
    params = {"conv1": _init_conv_bn(kg, 7, 7, 3, 64)}
    layers = []
    inplanes = 64
    for planes, blocks, stride in ((64, 3, 1), (128, 4, 2), (256, 6, 2), (512, 3, 2)):
        layer, inplanes = _make_layer(kg, inplanes, planes, blocks, stride)
        layers.append(layer)
    params["layers"] = layers
    in_f = inplanes  # 2048
    bound = 1.0 / float(in_f) ** 0.5
    n_pad = ((num_classes + LANE - 1) // LANE) * LANE  # lane-dense fc output
    fc_w = jax.random.uniform(kg(), (in_f, num_classes), jnp.float32, -bound, bound)
    fc_b = jax.random.uniform(kg(), (num_classes,), jnp.float32, -bound, bound)
    params["fc_w"] = jnp.pad(fc_w, ((0, 0), (0, n_pad - num_classes))).astype(jnp.bfloat16)
    params["fc_b"] = jnp.pad(fc_b, (0, n_pad - num_classes))
    params["num_classes"] = num_classes
    return params


# ------------------------------- Forward pass --------------------------------

def bottleneck(x, blk):
    N = x.shape[0]
    out = conv_bn(x, blk["conv1"], stride=1, pad=0, relu=True)
    out = conv_bn(out, blk["conv2"], stride=blk["stride"], pad=1, relu=True)
    if blk["down"] is not None:
        identity = conv_bn(x, blk["down"], stride=blk["stride"], pad=0, relu=False)
    else:
        identity = x
    Ho, Wo = out.shape[1], out.shape[2]
    cout = blk["conv3"]["w"].shape[1]
    res2d = identity.reshape(N * Ho * Wo, cout)
    # conv3 + BN + residual add + ReLU fused into a single kernel epilogue
    return conv_bn(out, blk["conv3"], stride=1, pad=0, relu=True, residual=res2d)


def resnet_forward(x_nchw, params):
    # NCHW (PyTorch) -> NHWC, bf16 activations (f32 accumulation in-kernel)
    x = jnp.transpose(x_nchw, (0, 2, 3, 1)).astype(jnp.bfloat16)
    x = conv_bn(x, params["conv1"], stride=2, pad=3, relu=True)   # conv1+bn+relu
    x = maxpool_3x3_s2_p1(x)                                      # maxpool
    for layer in params["layers"]:                                # layer1..layer4
        for blk in layer:
            x = bottleneck(x, blk)
    logits_pad = avgpool_fc(x, params["fc_w"], params["fc_b"])    # avgpool + fc
    return logits_pad[:, :params["num_classes"]]


if __name__ == "__main__":
    params = init_resnet50_params(seed=1, num_classes=NUM_CLASSES)
    x = jax.random.normal(jax.random.PRNGKey(0), (2, 3, 64, 64), jnp.float32)  # NCHW
    logits = resnet_forward(x, params)
    logits = jax.block_until_ready(logits)
    assert logits.shape == (2, NUM_CLASSES)
    assert bool(jnp.all(jnp.isfinite(logits)))
    print("KERNEL_OK")
</pallas_src>

<mosaic_0001>
module attributes {stable_mosaic.version = 11 : i64} {
  func.func @_mm_kernel(%arg0: i32, %arg1: i32, %arg2: i32, %arg3: memref<256x152xbf16, #tpu.memory_space<vmem>>, %arg4: memref<152x64xbf16, #tpu.memory_space<vmem>>, %arg5: memref<1x64xf32, #tpu.memory_space<vmem>>, %arg6: memref<256x64xbf16, #tpu.memory_space<vmem>>, %arg7: memref<256x64xf32, #tpu.memory_space<vmem>>) attributes {dimension_semantics = [#tpu.dimension_semantics<parallel>, #tpu.dimension_semantics<parallel>, #tpu.dimension_semantics<arbitrary>], iteration_bounds = array<i64: 8, 1, 1>, scalar_prefetch = 0 : i64, scratch_operands = 1 : i64, tpu.core_type = #tpu.core_type<tc>, window_params = [{transform_indices = @transform_0, window_bounds = array<i64: 256, 152>}, {transform_indices = @transform_1, window_bounds = array<i64: 152, 64>}, {transform_indices = @transform_2, window_bounds = array<i64: 1, 64>}, {transform_indices = @transform_3, window_bounds = array<i64: 256, 64>}]} {
    %c0_i32 = arith.constant 0 : i32
    %0 = arith.cmpi eq, %arg2, %c0_i32 : i32
    %1 = arith.extui %0 : i1 to i32
    %c0_i32_0 = arith.constant 0 : i32
    %2 = arith.cmpi ne, %1, %c0_i32_0 : i32
    scf.if %2 {
      %cst_10 = arith.constant 0.000000e+00 : f32
      %12 = vector.broadcast %cst_10 : f32 to vector<256x64xf32>
      %c0_11 = arith.constant 0 : index
      %c0_12 = arith.constant 0 : index
      %13 = vector.load %arg7[%c0_11, %c0_12] : memref<256x64xf32, #tpu.memory_space<vmem>>, vector<256x64xf32>
      tpu.vector_store %arg7[%c0_11, %c0_12], %12 {strides = array<i32>} : memref<256x64xf32, #tpu.memory_space<vmem>>, vector<256x64xf32>,
    } else {
    }
    %c0 = arith.constant 0 : index
    %c0_1 = arith.constant 0 : index
    %3 = vector.load %arg7[%c0, %c0_1] : memref<256x64xf32, #tpu.memory_space<vmem>>, vector<256x64xf32>
    %c0_2 = arith.constant 0 : index
    %c0_3 = arith.constant 0 : index
    %4 = vector.load %arg3[%c0_2, %c0_3] : memref<256x152xbf16, #tpu.memory_space<vmem>>, vector<256x152xbf16>
    %c0_4 = arith.constant 0 : index
    %c0_5 = arith.constant 0 : index
    %5 = vector.load %arg4[%c0_4, %c0_5] : memref<152x64xbf16, #tpu.memory_space<vmem>>, vector<152x64xbf16>
    %cst = arith.constant dense<0.000000e+00> : vector<256x64xf32>
    %6 = tpu.matmul %4, %5, %cst {dimension_numbers = #tpu.dot_dimension_numbers<[1], [0], [0], [1], [0, 0, 1, 1], [], []>} : vector<256x152xbf16>, vector<152x64xbf16>, vector<256x64xf32> -> vector<256x64xf32>
    %7 = arith.addf %3, %6 : vector<256x64xf32>
    %c0_6 = arith.constant 0 : index
    %c0_7 = arith.constant 0 : index
    %8 = vector.load %arg7[%c0_6, %c0_7] : memref<256x64xf32, #tpu.memory_space<vmem>>, vector<256x64xf32>
    tpu.vector_store %arg7[%c0_6, %c0_7], %7 {strides = array<i32>} : memref<256x64xf32, #tpu.memory_space<vmem>>, vector<256x64xf32>,
    %c0_i32_8 = arith.constant 0 : i32
    %9 = arith.cmpi eq, %arg2, %c0_i32_8 : i32
    %10 = arith.extui %9 : i1 to i32
    %c0_i32_9 = arith.constant 0 : i32
    %11 = arith.cmpi ne, %10, %c0_i32_9 : i32
    scf.if %11 {
      %c0_10 = arith.constant 0 : index
      %c0_11 = arith.constant 0 : index
      %12 = vector.load %arg7[%c0_10, %c0_11] : memref<256x64xf32, #tpu.memory_space<vmem>>, vector<256x64xf32>
      %c0_12 = arith.constant 0 : index
      %c0_13 = arith.constant 0 : index
      %13 = vector.load %arg5[%c0_12, %c0_13] : memref<1x64xf32, #tpu.memory_space<vmem>>, vector<1x64xf32>
      %14 = vector.broadcast %13 : vector<1x64xf32> to vector<256x64xf32>
      %15 = arith.addf %12, %14 : vector<256x64xf32>
      %cst_14 = arith.constant 0.000000e+00 : f32
      %16 = vector.broadcast %cst_14 : f32 to vector<256x64xf32>
      %17 = arith.maximumf %15, %16 : vector<256x64xf32>
      %18 = arith.truncf %17 : vector<256x64xf32> to vector<256x64xbf16>
      %c0_15 = arith.constant 0 : index
      %c0_16 = arith.constant 0 : index
      %19 = vector.load %arg6[%c0_15, %c0_16] : memref<256x64xbf16, #tpu.memory_space<vmem>>, vector<256x64xbf16>
      tpu.vector_store %arg6[%c0_15, %c0_16], %18 {strides = array<i32>} : memref<256x64xbf16, #tpu.memory_space<vmem>>, vector<256x64xbf16>,
    } else {
    }
    return
  }
  func.func @transform_0(%arg0: i32, %arg1: i32, %arg2: i32) -> (i32, i32) {
    %c0_i32 = arith.constant 0 : i32
    return %arg0, %arg2 : i32, i32
  }
  func.func @transform_1(%arg0: i32, %arg1: i32, %arg2: i32) -> (i32, i32) {
    %c0_i32 = arith.constant 0 : i32
    return %arg2, %arg1 : i32, i32
  }
  func.func @transform_2(%arg0: i32, %arg1: i32, %arg2: i32) -> (i32, i32) {
    %c0_i32 = arith.constant 0 : i32
    %c0_i32_0 = arith.constant 0 : i32
    return %c0_i32, %arg1 : i32, i32
  }
  func.func @transform_3(%arg0: i32, %arg1: i32, %arg2: i32) -> (i32, i32) {
    %c0_i32 = arith.constant 0 : i32
    return %arg0, %arg1 : i32, i32
  }
}

</mosaic_0001>

<bundles_post_ra>
// kernel: tpu_custom_call.1
= control target key start
LH: loop header
LB: loop body
LE: loop exit
PB: predicated region body
PF: predicated region fallthrough
CT: control target
= control target key end

     0   :  { %s1537_s12 = smov 0   ;;  %s1539_s13 = smov 0   ;;  %s1841_s0 = inlined_call_operand.vmem [shape: bf16[2048,152], index: 0, kind: input, shape index: {}]   ;;  %s1842_s1 = inlined_call_operand.vmem [shape: bf16[152,64], index: 1, kind: input, shape index: {}]   ;;  %s1843_s2 = inlined_call_operand.vmem [shape: f32[1,64], index: 2, kind: input, shape index: {}]   ;;  %s1844_s3 = inlined_call_operand.vmem [shape: bf16[2048,64], index: 3, kind: output, shape index: {}]  }
   0x1   :  { %s1541_s14 = smov 0  }
   0x2 LB: > { %s32_s15 = sadd.s32 1, %s1509_s13  ;;  %p1255_p0 = scmp.ge.s32.totalorder %s1513_s14, 1  ;;  %s1513_s14 = sphi %s1541_s14, %s13_s14   ;;  %s1509_s13 = sphi %s1539_s13, %s1846_s13   ;;  %s1505_s12 = sphi %s1537_s12, %s1845_s12  }
   0x3   : > { %p34_p1 = scmp.ge.s32.totalorder %s32_s15, 8  ;;  %p191_p2 = scmp.lt.s32.totalorder %s1513_s14, 9 }
   0x5   : > { %s1848_s15 = smov (%p34_p1, %s32_s15), 0  ;;  %p192_p3 = pnand %p1255_p0, %p191_p2 }
   0x6   : > { %v1433_v0 = vld [vmem:[%s1842_s1] sm:$0xff] (!%p192_p3)   ;;  %v1515_v1 = vmov (!%p192_p3), 0   ;;  %v1434_v2 = vld [vmem:[%s1842_s1 + $0x8] sm:$0xff] (!%p192_p3)   ;;  %s1256_s20 = sshll.u32 (!%p192_p3), %s1505_s12, 5  ;;  %v1435_v3 = vld [vmem:[%s1842_s1 + $0x10] sm:$0xff] (!%p192_p3)   ;;  %vm272_vm0 = vcmask (!%p192_p3), 523264  }
   0x7   : > { %195 = sbr.rel (%p192_p3) target bundleno = 337 (0x151), region = 32  ;;  %642 = vmatprep.subr.bf16.mxu0 (!%p192_p3), %v1515_v1  ;;  %1387 = vmatprep.subr.bf16.mxu1 (!%p192_p3), %v1515_v1  ;;  %p236_p4 = scmp.lt.s32.totalorder (!%p192_p3), %s1256_s20, 255  ;;  %vm589_vm1 = vcmask (!%p192_p3), 195584   ;;  %v1436_v4 = vld [vmem:[%s1842_s1 + $0x18] sm:$0xff] (!%p192_p3)   ;;  %v1516_v6 = vmov (!%p192_p3), 0.0   ;;  %v1437_v8 = vld [vmem:[%s1842_s1 + $0x20] sm:$0xff] (!%p192_p3)  }
   0x8   : > { %643 = vmatpush1.bf16.msra.mxu0 (!%p192_p3), %v1433_v0  ;;  %1397 = vmatpush1.bf16.msra.mxu1 (!%p192_p3), %v1433_v0  ;;  %273 = vst.msk [vmem:[#allocation2] sm:$0xff] (!%p192_p3), %vm272_vm0, %v1516_v6  ;;  %274 = vst.msk [vmem:[#allocation2 + $0x8] sm:$0xff] (!%p192_p3), %vm272_vm0, %v1516_v6  ;;  %v1438_v9 = vld [vmem:[%s1842_s1 + $0x28] sm:$0xff] (!%p192_p3)   ;;  %v1439_v10 = vld [vmem:[%s1842_s1 + $0x30] sm:$0xff] (!%p192_p3)   ;;  %vm638_vm2 = vcmask (!%p192_p3), 1043456   ;;  %vm1102_vm3 = vcmask (!%p192_p3), 519168  }
   0x9   : > { %644 = vmatprep.subr.bf16.mxu0 (!%p192_p3), %v1515_v1  ;;  %1388 = vmatprep.subr.bf16.mxu1 (!%p192_p3), %v1515_v1  ;;  %275 = vst.msk [vmem:[#allocation2 + $0x10] sm:$0xff] (!%p192_p3), %vm272_vm0, %v1516_v6  ;;  %276 = vst.msk [vmem:[#allocation2 + $0x18] sm:$0xff] (!%p192_p3), %vm272_vm0, %v1516_v6  ;;  %v1440_v11 = vld [vmem:[%s1842_s1 + $0x38] sm:$0xff] (!%p192_p3)   ;;  %v1441_v12 = vld [vmem:[%s1842_s1 + $0x40] sm:$0xff] (!%p192_p3)  }
   0xa   : > { %277 = vst.msk [vmem:[#allocation2 + $0x20] sm:$0xff] (!%p192_p3), %vm272_vm0, %v1516_v6  ;;  %278 = vst.msk [vmem:[#allocation2 + $0x28] sm:$0xff] (!%p192_p3), %vm272_vm0, %v1516_v6  ;;  %v1442_v13 = vld [vmem:[%s1842_s1 + $0x48] ss:$0 sps:$4 sm:$0xff] (!%p192_p3)   ;;  %v1700_v63 = vld [vmem:[%s1843_s2] ss:$0 sm:$0xff] (!%p192_p3) }
   0xb   : > { %279 = vst.msk [vmem:[#allocation2 + $0x30] sm:$0xff] (!%p192_p3), %vm272_vm0, %v1516_v6  ;;  %280 = vst.msk [vmem:[#allocation2 + $0x38] sm:$0xff] (!%p192_p3), %vm272_vm0, %v1516_v6  ;;  %v640_v14 = vsel (!%p192_p3), %vm638_vm2, %v1442_v13, 0 }
   0xc   : > { %645 = vmatpush1.bf16.msra.mxu0 (!%p192_p3), %v1434_v2  ;;  %1398 = vmatpush1.bf16.msra.mxu1 (!%p192_p3), %v1434_v2  ;;  %281 = vst.msk [vmem:[#allocation2 + $0x40] sm:$0xff] (!%p192_p3), %vm272_vm0, %v1516_v6  ;;  %282 = vst.msk [vmem:[#allocation2 + $0x48] sm:$0xff] (!%p192_p3), %vm272_vm0, %v1516_v6 }
   0xd   : > { %646 = vmatprep.subr.bf16.mxu0 (!%p192_p3), %v1515_v1  ;;  %1389 = vmatprep.subr.bf16.mxu1 (!%p192_p3), %v1515_v1  ;;  %283 = vst.msk [vmem:[#allocation2 + $0x50] sm:$0xff] (!%p192_p3), %vm272_vm0, %v1516_v6  ;;  %284 = vst.msk [vmem:[#allocation2 + $0x58] sm:$0xff] (!%p192_p3), %vm272_vm0, %v1516_v6 }
   0xe   : > { %s1850_s20 = smov (!%p236_p4, %s1256_s20), 255  ;;  %285 = vst.msk [vmem:[#allocation2 + $0x60] sm:$0xff] %vm272_vm0, %v1516_v6  ;;  %286 = vst.msk [vmem:[#allocation2 + $0x68] sm:$0xff] %vm272_vm0, %v1516_v6 }
   0xf   : > { %s1354_s23 = sshll.u32 %s1850_s20, 3  ;;  %287 = vst.msk [vmem:[#allocation2 + $0x70] sm:$0xff] %vm272_vm0, %v1516_v6  ;;  %288 = vst.msk [vmem:[#allocation2 + $0x78] sm:$0xff] %vm272_vm0, %v1516_v6  ;;  %v305_v45 = vld [vmem:[#allocation2] sm:$0xff]  ;;  %v306_v49 = vld [vmem:[#allocation2 + $0x8] sm:$0xff]  ;;  %s1260_s19 = sshll.u32 %s1850_s20, 2 }
  0x10   : > { %s1576_s26 = scalar_lea.vmem %s1841_s0, %s1354_s23  ;;  %647 = vmatpush1.bf16.msra.mxu0 %v1435_v3  ;;  %1399 = vmatpush1.bf16.msra.mxu1 %v1435_v3  ;;  %289 = vst.msk [vmem:[#allocation2 + $0x80] sm:$0xff] %vm272_vm0, %v1516_v6  ;;  %290 = vst.msk [vmem:[#allocation2 + $0x88] sm:$0xff] %vm272_vm0, %v1516_v6  ;;  %v307_v61 = vld [vmem:[#allocation2 + $0x10] sm:$0xff]  ;;  %v308_v2 = vld [vmem:[#allocation2 + $0x18] sm:$0xff]  ;;  %s1714_s22 = scalar_lea.vmem %s1844_s3, %s1260_s19 }
  0x11   : > { %v1445_v5 = vld [vmem:[%s1576_s26 + $0x4] ss:$8 sps:$4 sm:$0xff]   ;;  %291 = vst.msk [vmem:[#allocation2 + $0x90] sm:$0xff] %vm272_vm0, %v1516_v6  ;;  %292 = vst.msk [vmem:[#allocation2 + $0x98] sm:$0xff] %vm272_vm0, %v1516_v6  ;;  %648 = vmatprep.subr.bf16.mxu0 %v1515_v1  ;;  %1390 = vmatprep.subr.bf16.mxu1 %v1515_v1  ;;  %v1443_v15 = vld [vmem:[%s1576_s26] ss:$8 sps:$4 sm:$0xff]  }
  0x12   : > { %293 = vst.msk [vmem:[#allocation2 + $0xa0] sm:$0xff] %vm272_vm0, %v1516_v6  ;;  %294 = vst.msk [vmem:[#allocation2 + $0xa8] sm:$0xff] %vm272_vm0, %v1516_v6  ;;  %1303 = vmatprep.mubr.msk.bf16.mxu0 %vm589_vm1, %v1445_v5  ;;  %v1448_v7 = vld [vmem:[%s1576_s26 + $0x84] ss:$8 sps:$4 sm:$0xff]   ;;  %v1446_v16 = vld [vmem:[%s1576_s26 + $0x80] ss:$8 sps:$4 sm:$0xff]  }
  0x13   : > { %295 = vst.msk [vmem:[#allocation2 + $0xb0] sm:$0xff] %vm272_vm0, %v1516_v6  ;;  %296 = vst.msk [vmem:[#allocation2 + $0xb8] sm:$0xff] %vm272_vm0, %v1516_v6  ;;  %1311 = vmatprep.mubr.msk.bf16.mxu1 %vm589_vm1, %v1448_v7  ;;  %v1449_v17 = vld [vmem:[%s1576_s26 + $0x14] ss:$8 sps:$4 sm:$0xff]   ;;  %v1453_v19 = vld [vmem:[%s1576_s26 + $0x10] ss:$8 sps:$4 sm:$0xff]  }
  0x14   : > { %297 = vst.msk [vmem:[#allocation2 + $0xc0] sm:$0xff] %vm272_vm0, %v1516_v6  ;;  %298 = vst.msk [vmem:[#allocation2 + $0xc8] sm:$0xff] %vm272_vm0, %v1516_v6  ;;  %649 = vmatpush1.bf16.msra.mxu0 %v1436_v4  ;;  %1400 = vmatpush1.bf16.msra.mxu1 %v1436_v4  ;;  %v1451_v18 = vld [vmem:[%s1576_s26 + $0x94] ss:$8 sps:$4 sm:$0xff]   ;;  %v1454_v20 = vld [vmem:[%s1576_s26 + $0x90] ss:$8 sps:$4 sm:$0xff]  }
  0x15   : > { %299 = vst.msk [vmem:[#allocation2 + $0xd0] sm:$0xff] %vm272_vm0, %v1516_v6  ;;  %300 = vst.msk [vmem:[#allocation2 + $0xd8] sm:$0xff] %vm272_vm0, %v1516_v6  ;;  %650 = vmatprep.subr.bf16.mxu0 %v1515_v1  ;;  %1391 = vmatprep.subr.bf16.mxu1 %v1515_v1  ;;  %v1455_v21 = vld [vmem:[%s1576_s26 + $0x24] ss:$8 sps:$4 sm:$0xff]   ;;  %v1459_v23 = vld [vmem:[%s1576_s26 + $0x20] ss:$8 sps:$4 sm:$0xff]  }
  0x16   : > { %301 = vst.msk [vmem:[#allocation2 + $0xe0] sm:$0xff] %vm272_vm0, %v1516_v6  ;;  %302 = vst.msk [vmem:[#allocation2 + $0xe8] sm:$0xff] %vm272_vm0, %v1516_v6  ;;  %v1457_v22 = vld [vmem:[%s1576_s26 + $0xa4] ss:$8 sps:$4 sm:$0xff]   ;;  %v1460_v24 = vld [vmem:[%s1576_s26 + $0xa0] ss:$8 sps:$4 sm:$0xff]  }
  0x17   : > { %303 = vst.msk [vmem:[#allocation2 + $0xf0] sm:$0xff] %vm272_vm0, %v1516_v6  ;;  %304 = vst.msk [vmem:[#allocation2 + $0xf8] sm:$0xff] %vm272_vm0, %v1516_v6  ;;  %v1461_v25 = vld [vmem:[%s1576_s26 + $0x34] ss:$8 sps:$4 sm:$0xff]   ;;  %v1465_v27 = vld [vmem:[%s1576_s26 + $0x30] ss:$8 sps:$4 sm:$0xff]  }
  0x18   : > { %651 = vmatpush1.bf16.msra.mxu0 %v1437_v8  ;;  %1401 = vmatpush1.bf16.msra.mxu1 %v1437_v8  ;;  %v1463_v26 = vld [vmem:[%s1576_s26 + $0xb4] ss:$8 sps:$4 sm:$0xff]   ;;  %v1466_v28 = vld [vmem:[%s1576_s26 + $0xb0] ss:$8 sps:$4 sm:$0xff]   ;;  %v1467_v29 = vld [vmem:[%s1576_s26 + $0x44] ss:$8 sps:$4 sm:$0xff]  }
  0x19   : > { %652 = vmatprep.subr.bf16.mxu0 %v1515_v1  ;;  %1392 = vmatprep.subr.bf16.mxu1 %v1515_v1  ;;  %v1469_v30 = vld [vmem:[%s1576_s26 + $0xc4] ss:$8 sps:$4 sm:$0xff]   ;;  %v1471_v31 = vld [vmem:[%s1576_s26 + $0x40] ss:$8 sps:$4 sm:$0xff]   ;;  %v1473_v33 = vld [vmem:[%s1576_s26 + $0x54] ss:$8 sps:$4 sm:$0xff]  }
  0x1a   : > { %v1472_v32 = vld [vmem:[%s1576_s26 + $0xc0] ss:$8 sps:$4 sm:$0xff]   ;;  %v1475_v34 = vld [vmem:[%s1576_s26 + $0xd4] ss:$8 sps:$4 sm:$0xff]   ;;  %v1477_v35 = vld [vmem:[%s1576_s26 + $0x50] ss:$8 sps:$4 sm:$0xff]  }
  0x1b   : > { %v1478_v36 = vld [vmem:[%s1576_s26 + $0xd0] ss:$8 sps:$4 sm:$0xff]   ;;  %v1479_v37 = vld [vmem:[%s1576_s26 + $0x64] ss:$8 sps:$4 sm:$0xff]   ;;  %v1483_v39 = vld [vmem:[%s1576_s26 + $0x60] ss:$8 sps:$4 sm:$0xff]  }
  0x1c   : > { %653 = vmatpush1.bf16.msra.mxu0 %v1438_v9  ;;  %1402 = vmatpush1.bf16.msra.mxu1 %v1438_v9  ;;  %v1481_v38 = vld [vmem:[%s1576_s26 + $0xe4] ss:$8 sps:$4 sm:$0xff]   ;;  %v1484_v40 = vld [vmem:[%s1576_s26 + $0xe0] ss:$8 sps:$4 sm:$0xff]   ;;  %v1485_v41 = vld [vmem:[%s1576_s26 + $0x74] ss:$8 sps:$4 sm:$0xff]  }
  0x1d   : > { %654 = vmatprep.subr.bf16.mxu0 %v1515_v1  ;;  %1393 = vmatprep.subr.bf16.mxu1 %v1515_v1  ;;  %v1487_v42 = vld [vmem:[%s1576_s26 + $0xf4] ss:$8 sps:$4 sm:$0xff]   ;;  %v1489_v43 = vld [vmem:[%s1576_s26 + $0x70] ss:$8 sps:$4 sm:$0xff]   ;;  %v321_v46 = vld [vmem:[#allocation2 + $0x80] sm:$0xff] }
  0x1e   : > { %v1490_v44 = vld [vmem:[%s1576_s26 + $0xf0] ss:$8 sps:$4 sm:$0xff]   ;;  %v322_v50 = vld [vmem:[#allocation2 + $0x88] sm:$0xff] }
  0x1f   : > { %v323_v62 = vld [vmem:[#allocation2 + $0x90] sm:$0xff]  ;;  %v324_v3 = vld [vmem:[#allocation2 + $0x98] sm:$0xff] }
  0x20   : > { %655 = vmatpush1.bf16.msra.mxu0 %v1439_v10  ;;  %1403 = vmatpush1.bf16.msra.mxu1 %v1439_v10 }
  0x21   : > { %656 = vmatprep.subr.bf16.mxu0 %v1515_v1  ;;  %1394 = vmatprep.subr.bf16.mxu1 %v1515_v1 }
  0x24   : > { %657 = vmatpush1.bf16.msra.mxu0 %v1440_v11  ;;  %1404 = vmatpush1.bf16.msra.mxu1 %v1440_v11 }
  0x25   : > { %658 = vmatprep.subr.bf16.mxu0 %v1515_v1  ;;  %1395 = vmatprep.subr.bf16.mxu1 %v1515_v1 }
  0x28   : > { %659 = vmatpush1.bf16.msra.mxu0 %v1441_v12  ;;  %1405 = vmatpush1.bf16.msra.mxu1 %v1441_v12 }
  0x29   : > { %660 = vmatprep.subr.bf16.mxu0 %v1515_v1  ;;  %1396 = vmatprep.subr.bf16.mxu1 %v1515_v1 }
  0x2c   : > { %661 = vmatpush1.bf16.msra.mxu0 %v640_v14  ;;  %1406 = vmatpush1.bf16.msra.mxu1 %v640_v14 }
  0x2f   : > { %675 = vmatmul.mubr.bf16.vlgmr.msra.gmra.mrb[0].mxu0 %v1443_v15  ;;  %739 = vmatmul.mubr.bf16.vlgmr.msra.gmra.mrb[0].mxu1 %v1446_v16 }
  0x30   : > { %1304 = vmatprep.mubr.msk.bf16.mxu0 %vm589_vm1, %v1449_v17  ;;  %1312 = vmatprep.mubr.msk.bf16.mxu1 %vm589_vm1, %v1451_v18 }
  0x37   : > { %683 = vmatmul.mubr.bf16.gmra.mrb[4].mxu0 %v1453_v19  ;;  %747 = vmatmul.mubr.bf16.gmra.mrb[4].mxu1 %v1454_v20 }
  0x38   : > { %1305 = vmatprep.mubr.msk.bf16.mxu0 %vm589_vm1, %v1455_v21  ;;  %1313 = vmatprep.mubr.msk.bf16.mxu1 %vm589_vm1, %v1457_v22 }
  0x3f   : > { %691 = vmatmul.mubr.bf16.gmra.mrb[8].mxu0 %v1459_v23  ;;  %755 = vmatmul.mubr.bf16.gmra.mrb[8].mxu1 %v1460_v24  ;;  %v309_v24 = vld [vmem:[#allocation2 + $0x20] sm:$0xff] }
  0x40   : > { %1306 = vmatprep.mubr.msk.bf16.mxu0 %vm589_vm1, %v1461_v25  ;;  %1314 = vmatprep.mubr.msk.bf16.mxu1 %vm589_vm1, %v1463_v26  ;;  %v325_v25 = vld [vmem:[#allocation2 + $0xa0] sm:$0xff] }
  0x47   : > { %699 = vmatmul.mubr.bf16.gmra.mrb[12].mxu0 %v1465_v27  ;;  %763 = vmatmul.mubr.bf16.gmra.mrb[12].mxu1 %v1466_v28 }
  0x48   : > { %1307 = vmatprep.mubr.msk.bf16.mxu0 %vm589_vm1, %v1467_v29  ;;  %1315 = vmatprep.mubr.msk.bf16.mxu1 %vm589_vm1, %v1469_v30 }
  0x4f   : > { %707 = vmatmul.mubr.bf16.gmra.mrb[16].mxu0 %v1471_v31  ;;  %771 = vmatmul.mubr.bf16.gmra.mrb[16].mxu1 %v1472_v32  ;;  %v310_v32 = vld [vmem:[#allocation2 + $0x28] sm:$0xff] }
  0x50   : > { %1308 = vmatprep.mubr.msk.bf16.mxu0 %vm589_vm1, %v1473_v33  ;;  %1316 = vmatprep.mubr.msk.bf16.mxu1 %vm589_vm1, %v1475_v34  ;;  %v326_v33 = vld [vmem:[#allocation2 + $0xa8] sm:$0xff] }
  0x57   : > { %715 = vmatmul.mubr.bf16.gmra.mrb[20].mxu0 %v1477_v35  ;;  %779 = vmatmul.mubr.bf16.gmra.mrb[20].mxu1 %v1478_v36 }
  0x58   : > { %1309 = vmatprep.mubr.msk.bf16.mxu0 %vm589_vm1, %v1479_v37  ;;  %1317 = vmatprep.mubr.msk.bf16.mxu1 %vm589_vm1, %v1481_v38 }
  0x5f   : > { %723 = vmatmul.mubr.bf16.gmra.mrb[24].mxu0 %v1483_v39  ;;  %787 = vmatmul.mubr.bf16.gmra.mrb[24].mxu1 %v1484_v40 }
  0x60   : > { %1310 = vmatprep.mubr.msk.bf16.mxu0 %vm589_vm1, %v1485_v41  ;;  %1318 = vmatprep.mubr.msk.bf16.mxu1 %vm589_vm1, %v1487_v42 }
  0x67   : > { %731 = vmatmul.mubr.bf16.gmra.mrb[28].mxu0 %v1489_v43  ;;  %795 = vmatmul.mubr.bf16.gmra.mrb[28].mxu1 %v1490_v44 }
 0x102   : > { %v676_v47 = vpop.f32.mrb[0].mxu0  ;;  %v740_v48 = vpop.f32.mrb[0].mxu1 }
 0x103   : > { %v803_v51 = vadd.f32 %v676_v47, %v305_v45  ;;  %v819_v52 = vadd.f32 %v740_v48, %v321_v46  ;;  %v678_v53 = vpop.f32.mrb[1].mxu0  ;;  %v742_v54 = vpop.f32.mrb[1].mxu1 }
 0x104   : > { %v679_v55 = vpop.f32.mrb[2].mxu0  ;;  %v743_v56 = vpop.f32.mrb[2].mxu1 }
 0x105   : > { %836 = vst.msk [vmem:[#allocation2] sm:$0xff] %vm272_vm0, %v803_v51  ;;  %852 = vst.msk [vmem:[#allocation2 + $0x80] sm:$0xff] %vm272_vm0, %v819_v52  ;;  %v804_v57 = vadd.f32 %v679_v55, %v306_v49  ;;  %v820_v58 = vadd.f32 %v743_v56, %v322_v50  ;;  %v681_v59 = vpop.f32.mrb[3].mxu0  ;;  %v745_v60 = vpop.f32.mrb[3].mxu1  ;;  %v311_v56 = vld [vmem:[#allocation2 + $0x30] sm:$0xff] }
 0x107   : > { %837 = vst.msk [vmem:[#allocation2 + $0x8] sm:$0xff] %vm272_vm0, %v804_v57  ;;  %853 = vst.msk [vmem:[#allocation2 + $0x88] sm:$0xff] %vm272_vm0, %v820_v58  ;;  %v327_v57 = vld [vmem:[#allocation2 + $0xb0] sm:$0xff] }
 0x10a   : > { %v684_v0 = vpop.f32.mrb[4].mxu0  ;;  %v748_v1 = vpop.f32.mrb[4].mxu1 }
 0x10b   : > { %v805_v4 = vadd.f32 %v684_v0, %v307_v61  ;;  %v821_v5 = vadd.f32 %v748_v1, %v323_v62  ;;  %v686_v6 = vpop.f32.mrb[5].mxu0  ;;  %v750_v7 = vpop.f32.mrb[5].mxu1  ;;  %v312_v1 = vld [vmem:[#allocation2 + $0x38] sm:$0xff] }
 0x10c   : > { %v871_v8 = vld [vmem:[#allocation2] sm:$0xff]  ;;  %v687_v10 = vpop.f32.mrb[6].mxu0  ;;  %v751_v11 = vpop.f32.mrb[6].mxu1 }
 0x10d   : > { %v887_v9 = vld [vmem:[#allocation2 + $0x80] sm:$0xff]  ;;  %v910_v12 = vadd.f32 %v1700_v63, %v871_v8  ;;  %838 = vst.msk [vmem:[#allocation2 + $0x10] sm:$0xff] %vm272_vm0, %v805_v4  ;;  %854 = vst.msk [vmem:[#allocation2 + $0x90] sm:$0xff] %vm272_vm0, %v821_v5  ;;  %v806_v14 = vadd.f32 %v687_v10, %v308_v2  ;;  %v822_v15 = vadd.f32 %v751_v11, %v324_v3  ;;  %v689_v16 = vpop.f32.mrb[7].mxu0  ;;  %v753_v17 = vpop.f32.mrb[7].mxu1  ;;  %v328_v2 = vld [vmem:[#allocation2 + $0xb8] sm:$0xff] }
 0x10e   : > { %v926_v13 = vadd.f32 %v1700_v63, %v887_v9  ;;  %v872_v18 = vld [vmem:[#allocation2 + $0x8] sm:$0xff] }
 0x10f   : > { %v888_v19 = vld [vmem:[#allocation2 + $0x88] sm:$0xff]  ;;  %v942_v20 = vmax.f32 %v910_v12, 0.0  ;;  %v911_v22 = vadd.f32 %v1700_v63, %v872_v18  ;;  %839 = vst.msk [vmem:[#allocation2 + $0x18] sm:$0xff] %vm272_vm0, %v806_v14  ;;  %855 = vst.msk [vmem:[#allocation2 + $0x98] sm:$0xff] %vm272_vm0, %v822_v15 }
 0x110   : > { %v958_v21 = vmax.f32 %v926_v13, 0.0  ;;  %v927_v23 = vadd.f32 %v1700_v63, %v888_v19 }
 0x111   : > { %v1355_v26 = vpack.c.bf16 %v942_v20, %v942_v20  ;;  %v943_v28 = vmax.f32 %v911_v22, 0.0 }
 0x112   : > { %v1371_v27 = vpack.c.bf16 %v958_v21, %v958_v21  ;;  %v959_v29 = vmax.f32 %v927_v23, 0.0  ;;  %v692_v30 = vpop.f32.mrb[8].mxu0  ;;  %v756_v31 = vpop.f32.mrb[8].mxu1 }
 0x113   : > { %1103 = vst.msk [vmem:[%s1714_s22] sm:$0xf] %vm1102_vm3, %v1355_v26  ;;  %v1356_v34 = vpack.c.bf16 %v943_v28, %v943_v28  ;;  %v807_v36 = vadd.f32 %v692_v30, %v309_v24  ;;  %v823_v37 = vadd.f32 %v756_v31, %v325_v25  ;;  %v694_v38 = vpop.f32.mrb[9].mxu0  ;;  %v758_v39 = vpop.f32.mrb[9].mxu1  ;;  %v313_v25 = vld [vmem:[#allocation2 + $0x40] sm:$0xff] }
 0x114   : > { %1119 = vst.msk [vmem:[%s1714_s22 + $0x40] sm:$0xf] %vm1102_vm3, %v1371_v27  ;;  %v1372_v35 = vpack.c.bf16 %v959_v29, %v959_v29  ;;  %v873_v40 = vld [vmem:[#allocation2 + $0x10] sm:$0xff]  ;;  %v695_v42 = vpop.f32.mrb[10].mxu0  ;;  %v759_v43 = vpop.f32.mrb[10].mxu1  ;;  %v329_v26 = vld [vmem:[#allocation2 + $0xc0] sm:$0xff] }
 0x115   : > { %v889_v41 = vld [vmem:[#allocation2 + $0x90] sm:$0xff]  ;;  %1104 = vst.msk [vmem:[%s1714_s22 + $0x4] sm:$0xf] %vm1102_vm3, %v1356_v34  ;;  %v912_v44 = vadd.f32 %v1700_v63, %v873_v40  ;;  %v808_v46 = vadd.f32 %v695_v42, %v310_v32  ;;  %v824_v47 = vadd.f32 %v759_v43, %v326_v33  ;;  %v697_v48 = vpop.f32.mrb[11].mxu0  ;;  %v761_v49 = vpop.f32.mrb[11].mxu1  ;;  %v314_v33 = vld [vmem:[#allocation2 + $0x48] sm:$0xff] }
 0x116   : > { %1120 = vst.msk [vmem:[%s1714_s22 + $0x44] sm:$0xf] %vm1102_vm3, %v1372_v35  ;;  %v928_v45 = vadd.f32 %v1700_v63, %v889_v41  ;;  %v874_v50 = vld [vmem:[#allocation2 + $0x18] sm:$0xff]  ;;  %v330_v34 = vld [vmem:[#allocation2 + $0xc8] sm:$0xff] }
 0x117   : > { %840 = vst.msk [vmem:[#allocation2 + $0x20] sm:$0xff] %vm272_vm0, %v807_v36  ;;  %856 = vst.msk [vmem:[#allocation2 + $0xa0] sm:$0xff] %vm272_vm0, %v823_v37  ;;  %v890_v51 = vld [vmem:[#allocation2 + $0x98] sm:$0xff]  ;;  %v944_v52 = vmax.f32 %v912_v44, 0.0  ;;  %v913_v54 = vadd.f32 %v1700_v63, %v874_v50 }
 0x118   : > { %v960_v53 = vmax.f32 %v928_v45, 0.0  ;;  %v929_v55 = vadd.f32 %v1700_v63, %v890_v51  ;;  %841 = vst.msk [vmem:[#allocation2 + $0x28] sm:$0xff] %vm272_vm0, %v808_v46  ;;  %857 = vst.msk [vmem:[#allocation2 + $0xa8] sm:$0xff] %vm272_vm0, %v824_v47 }
 0x119   : > { %v1357_v58 = vpack.c.bf16 %v944_v52, %v944_v52  ;;  %v945_v60 = vmax.f32 %v913_v54, 0.0 }
 0x11a   : > { %v1373_v59 = vpack.c.bf16 %v960_v53, %v960_v53  ;;  %v961_v61 = vmax.f32 %v929_v55, 0.0  ;;  %v700_v62 = vpop.f32.mrb[12].mxu0  ;;  %v764_v0 = vpop.f32.mrb[12].mxu1 }
 0x11b   : > { %1105 = vst.msk [vmem:[%s1714_s22 + $0x8] sm:$0xf] %vm1102_vm3, %v1357_v58  ;;  %v1358_v3 = vpack.c.bf16 %v945_v60, %v945_v60  ;;  %v809_v5 = vadd.f32 %v700_v62, %v311_v56  ;;  %v825_v6 = vadd.f32 %v764_v0, %v327_v57  ;;  %v702_v7 = vpop.f32.mrb[13].mxu0  ;;  %v766_v8 = vpop.f32.mrb[13].mxu1  ;;  %v315_v57 = vld [vmem:[#allocation2 + $0x50] sm:$0xff] }
 0x11c   : > { %1121 = vst.msk [vmem:[%s1714_s22 + $0x48] sm:$0xf] %vm1102_vm3, %v1373_v59  ;;  %v1374_v4 = vpack.c.bf16 %v961_v61, %v961_v61  ;;  %v703_v11 = vpop.f32.mrb[14].mxu0  ;;  %v767_v12 = vpop.f32.mrb[14].mxu1  ;;  %v331_v58 = vld [vmem:[#allocation2 + $0xd0] sm:$0xff] }
 0x11d   : > { %1106 = vst.msk [vmem:[%s1714_s22 + $0xc] sm:$0xf] %vm1102_vm3, %v1358_v3  ;;  %v810_v15 = vadd.f32 %v703_v11, %v312_v1  ;;  %v826_v16 = vadd.f32 %v767_v12, %v328_v2  ;;  %v705_v17 = vpop.f32.mrb[15].mxu0  ;;  %v769_v18 = vpop.f32.mrb[15].mxu1  ;;  %v316_v2 = vld [vmem:[#allocation2 + $0x58] sm:$0xff] }
 0x11e   : > { %v875_v9 = vld [vmem:[#allocation2 + $0x20] sm:$0xff]  ;;  %1122 = vst.msk [vmem:[%s1714_s22 + $0x4c] sm:$0xf] %vm1102_vm3, %v1374_v4  ;;  %v332_v3 = vld [vmem:[#allocation2 + $0xd8] sm:$0xff] }
 0x11f   : > { %v891_v10 = vld [vmem:[#allocation2 + $0xa0] sm:$0xff]  ;;  %v914_v13 = vadd.f32 %v1700_v63, %v875_v9  ;;  %842 = vst.msk [vmem:[#allocation2 + $0x30] sm:$0xff] %vm272_vm0, %v809_v5  ;;  %858 = vst.msk [vmem:[#allocation2 + $0xb0] sm:$0xff] %vm272_vm0, %v825_v6  ;;  %v876_v19 = vld [vmem:[#allocation2 + $0x28] sm:$0xff] }
 0x120   : > { %v930_v14 = vadd.f32 %v1700_v63, %v891_v10  ;;  %v892_v20 = vld [vmem:[#allocation2 + $0xa8] sm:$0xff]  ;;  %v915_v23 = vadd.f32 %v1700_v63, %v876_v19  ;;  %843 = vst.msk [vmem:[#allocation2 + $0x38] sm:$0xff] %vm272_vm0, %v810_v15  ;;  %859 = vst.msk [vmem:[#allocation2 + $0xb8] sm:$0xff] %vm272_vm0, %v826_v16 }
 0x121   : > { %v946_v21 = vmax.f32 %v914_v13, 0.0  ;;  %v931_v24 = vadd.f32 %v1700_v63, %v892_v20 }
 0x122   : > { %v962_v22 = vmax.f32 %v930_v14, 0.0  ;;  %v947_v29 = vmax.f32 %v915_v23, 0.0  ;;  %v708_v31 = vpop.f32.mrb[16].mxu0  ;;  %v772_v32 = vpop.f32.mrb[16].mxu1 }
 0x123   : > { %v1359_v27 = vpack.c.bf16 %v946_v21, %v946_v21  ;;  %v963_v30 = vmax.f32 %v931_v24, 0.0  ;;  %v811_v37 = vadd.f32 %v708_v31, %v313_v25  ;;  %v827_v38 = vadd.f32 %v772_v32, %v329_v26  ;;  %v710_v39 = vpop.f32.mrb[17].mxu0  ;;  %v774_v40 = vpop.f32.mrb[17].mxu1  ;;  %v317_v26 = vld [vmem:[#allocation2 + $0x60] sm:$0xff] }
 0x124   : > { %v1375_v28 = vpack.c.bf16 %v962_v22, %v962_v22  ;;  %v1360_v35 = vpack.c.bf16 %v947_v29, %v947_v29  ;;  %v711_v43 = vpop.f32.mrb[18].mxu0  ;;  %v775_v44 = vpop.f32.mrb[18].mxu1 }
 0x125   : > { %1107 = vst.msk [vmem:[%s1714_s22 + $0x10] sm:$0xf] %vm1102_vm3, %v1359_v27  ;;  %v1376_v36 = vpack.c.bf16 %v963_v30, %v963_v30  ;;  %v812_v47 = vadd.f32 %v711_v43, %v314_v33  ;;  %v828_v48 = vadd.f32 %v775_v44, %v330_v34  ;;  %v713_v49 = vpop.f32.mrb[19].mxu0  ;;  %v777_v50 = vpop.f32.mrb[19].mxu1  ;;  %v333_v27 = vld [vmem:[#allocation2 + $0xe0] sm:$0xff]  ;;  %v318_v34 = vld [vmem:[#allocation2 + $0x68] sm:$0xff] }
 0x126   : > { %1123 = vst.msk [vmem:[%s1714_s22 + $0x50] sm:$0xf] %vm1102_vm3, %v1375_v28  ;;  %v877_v41 = vld [vmem:[#allocation2 + $0x30] sm:$0xff]  ;;  %1108 = vst.msk [vmem:[%s1714_s22 + $0x14] sm:$0xf] %vm1102_vm3, %v1360_v35  ;;  %v334_v35 = vld [vmem:[#allocation2 + $0xe8] sm:$0xff] }
 0x127   : > { %v893_v42 = vld [vmem:[#allocation2 + $0xb0] sm:$0xff]  ;;  %1124 = vst.msk [vmem:[%s1714_s22 + $0x54] sm:$0xf] %vm1102_vm3, %v1376_v36  ;;  %v916_v45 = vadd.f32 %v1700_v63, %v877_v41  ;;  %v878_v51 = vld [vmem:[#allocation2 + $0x38] sm:$0xff] }
 0x128   : > { %v932_v46 = vadd.f32 %v1700_v63, %v893_v42  ;;  %844 = vst.msk [vmem:[#allocation2 + $0x40] sm:$0xff] %vm272_vm0, %v811_v37  ;;  %860 = vst.msk [vmem:[#allocation2 + $0xc0] sm:$0xff] %vm272_vm0, %v827_v38  ;;  %v894_v52 = vld [vmem:[#allocation2 + $0xb8] sm:$0xff]  ;;  %v917_v55 = vadd.f32 %v1700_v63, %v878_v51 }
 0x129   : > { %v948_v53 = vmax.f32 %v916_v45, 0.0  ;;  %v933_v56 = vadd.f32 %v1700_v63, %v894_v52  ;;  %845 = vst.msk [vmem:[#allocation2 + $0x48] sm:$0xff] %vm272_vm0, %v812_v47  ;;  %861 = vst.msk [vmem:[#allocation2 + $0xc8] sm:$0xff] %vm272_vm0, %v828_v48 }
 0x12a   : > { %v964_v54 = vmax.f32 %v932_v46, 0.0  ;;  %v949_v61 = vmax.f32 %v917_v55, 0.0  ;;  %v716_v0 = vpop.f32.mrb[20].mxu0  ;;  %v780_v1 = vpop.f32.mrb[20].mxu1 }
 0x12b   : > { %v1361_v59 = vpack.c.bf16 %v948_v53, %v948_v53  ;;  %v965_v62 = vmax.f32 %v933_v56, 0.0  ;;  %v813_v6 = vadd.f32 %v716_v0, %v315_v57  ;;  %v829_v7 = vadd.f32 %v780_v1, %v331_v58  ;;  %v718_v8 = vpop.f32.mrb[21].mxu0  ;;  %v782_v9 = vpop.f32.mrb[21].mxu1  ;;  %v319_v58 = vld [vmem:[#allocation2 + $0x70] sm:$0xff] }
 0x12c   : > { %v1377_v60 = vpack.c.bf16 %v964_v54, %v964_v54  ;;  %v1362_v4 = vpack.c.bf16 %v949_v61, %v949_v61  ;;  %v719_v12 = vpop.f32.mrb[22].mxu0  ;;  %v783_v13 = vpop.f32.mrb[22].mxu1 }
 0x12d   : > { %1109 = vst.msk [vmem:[%s1714_s22 + $0x18] sm:$0xf] %vm1102_vm3, %v1361_v59  ;;  %v1378_v5 = vpack.c.bf16 %v965_v62, %v965_v62  ;;  %v814_v16 = vadd.f32 %v719_v12, %v316_v2  ;;  %v830_v17 = vadd.f32 %v783_v13, %v332_v3  ;;  %v721_v18 = vpop.f32.mrb[23].mxu0  ;;  %v785_v19 = vpop.f32.mrb[23].mxu1  ;;  %v335_v59 = vld [vmem:[#allocation2 + $0xf0] sm:$0xff]  ;;  %v320_v3 = vld [vmem:[#allocation2 + $0x78] sm:$0xff] }
 0x12e   : > { %1125 = vst.msk [vmem:[%s1714_s22 + $0x58] sm:$0xf] %vm1102_vm3, %v1377_v60  ;;  %1110 = vst.msk [vmem:[%s1714_s22 + $0x1c] sm:$0xf] %vm1102_vm3, %v1362_v4  ;;  %v336_v4 = vld [vmem:[#allocation2 + $0xf8] sm:$0xff] }
 0x12f   : > { %v879_v10 = vld [vmem:[#allocation2 + $0x40] sm:$0xff]  ;;  %1126 = vst.msk [vmem:[%s1714_s22 + $0x5c] sm:$0xf] %vm1102_vm3, %v1378_v5 }
 0x130   : > { %v895_v11 = vld [vmem:[#allocation2 + $0xc0] sm:$0xff]  ;;  %v918_v14 = vadd.f32 %v1700_v63, %v879_v10  ;;  %846 = vst.msk [vmem:[#allocation2 + $0x50] sm:$0xff] %vm272_vm0, %v813_v6  ;;  %862 = vst.msk [vmem:[#allocation2 + $0xd0] sm:$0xff] %vm272_vm0, %v829_v7  ;;  %v880_v20 = vld [vmem:[#allocation2 + $0x48] sm:$0xff] }
 0x131   : > { %v934_v15 = vadd.f32 %v1700_v63, %v895_v11  ;;  %v896_v21 = vld [vmem:[#allocation2 + $0xc8] sm:$0xff]  ;;  %v919_v24 = vadd.f32 %v1700_v63, %v880_v20  ;;  %847 = vst.msk [vmem:[#allocation2 + $0x58] sm:$0xff] %vm272_vm0, %v814_v16  ;;  %863 = vst.msk [vmem:[#allocation2 + $0xd8] sm:$0xff] %vm272_vm0, %v830_v17 }
 0x132   : > { %v950_v22 = vmax.f32 %v918_v14, 0.0  ;;  %v935_v25 = vadd.f32 %v1700_v63, %v896_v21  ;;  %v724_v32 = vpop.f32.mrb[24].mxu0  ;;  %v788_v33 = vpop.f32.mrb[24].mxu1 }
 0x133   : > { %v966_v23 = vmax.f32 %v934_v15, 0.0  ;;  %v951_v30 = vmax.f32 %v919_v24, 0.0  ;;  %v815_v38 = vadd.f32 %v724_v32, %v317_v26  ;;  %v831_v39 = vadd.f32 %v788_v33, %v333_v27  ;;  %v726_v40 = vpop.f32.mrb[25].mxu0  ;;  %v790_v41 = vpop.f32.mrb[25].mxu1 }
 0x134   : > { %v1363_v28 = vpack.c.bf16 %v950_v22, %v950_v22  ;;  %v967_v31 = vmax.f32 %v935_v25, 0.0  ;;  %v727_v44 = vpop.f32.mrb[26].mxu0  ;;  %v791_v45 = vpop.f32.mrb[26].mxu1 }
 0x135   : > { %v1379_v29 = vpack.c.bf16 %v966_v23, %v966_v23  ;;  %v1364_v36 = vpack.c.bf16 %v951_v30, %v951_v30  ;;  %848 = vst.msk [vmem:[#allocation2 + $0x60] sm:$0xff] %vm272_vm0, %v815_v38  ;;  %864 = vst.msk [vmem:[#allocation2 + $0xe0] sm:$0xff] %vm272_vm0, %v831_v39  ;;  %v816_v48 = vadd.f32 %v727_v44, %v318_v34  ;;  %v729_v50 = vpop.f32.mrb[27].mxu0  ;;  %v793_v51 = vpop.f32.mrb[27].mxu1 }
 0x136   : > { %1111 = vst.msk [vmem:[%s1714_s22 + $0x20] sm:$0xf] %vm1102_vm3, %v1363_v28  ;;  %v1380_v37 = vpack.c.bf16 %v967_v31, %v967_v31  ;;  %v832_v49 = vadd.f32 %v791_v45, %v334_v35 }
 0x137   : > { %1127 = vst.msk [vmem:[%s1714_s22 + $0x60] sm:$0xf] %vm1102_vm3, %v1379_v29  ;;  %v881_v42 = vld [vmem:[#allocation2 + $0x50] sm:$0xff]  ;;  %1112 = vst.msk [vmem:[%s1714_s22 + $0x24] sm:$0xf] %vm1102_vm3, %v1364_v36 }
 0x138   : > { %v897_v43 = vld [vmem:[#allocation2 + $0xd0] sm:$0xff]  ;;  %1128 = vst.msk [vmem:[%s1714_s22 + $0x64] sm:$0xf] %vm1102_vm3, %v1380_v37  ;;  %v920_v46 = vadd.f32 %v1700_v63, %v881_v42  ;;  %v882_v52 = vld [vmem:[#allocation2 + $0x58] sm:$0xff] }
 0x139   : > { %v936_v47 = vadd.f32 %v1700_v63, %v897_v43  ;;  %v898_v53 = vld [vmem:[#allocation2 + $0xd8] sm:$0xff]  ;;  %v921_v56 = vadd.f32 %v1700_v63, %v882_v52  ;;  %849 = vst.msk [vmem:[#allocation2 + $0x68] sm:$0xff] %vm272_vm0, %v816_v48  ;;  %865 = vst.msk [vmem:[#allocation2 + $0xe8] sm:$0xff] %vm272_vm0, %v832_v49 }
 0x13a   : > { %v952_v54 = vmax.f32 %v920_v46, 0.0  ;;  %v937_v57 = vadd.f32 %v1700_v63, %v898_v53  ;;  %v732_v1 = vpop.f32.mrb[28].mxu0  ;;  %v796_v2 = vpop.f32.mrb[28].mxu1 }
 0x13b   : > { %v968_v55 = vmax.f32 %v936_v47, 0.0  ;;  %v953_v62 = vmax.f32 %v921_v56, 0.0  ;;  %v817_v7 = vadd.f32 %v732_v1, %v319_v58  ;;  %v833_v8 = vadd.f32 %v796_v2, %v335_v59  ;;  %v734_v9 = vpop.f32.mrb[29].mxu0  ;;  %v798_v10 = vpop.f32.mrb[29].mxu1 }
 0x13c   : > { %v1365_v60 = vpack.c.bf16 %v952_v54, %v952_v54  ;;  %v969_v0 = vmax.f32 %v937_v57, 0.0  ;;  %v883_v11 = vld [vmem:[#allocation2 + $0x60] sm:$0xff]  ;;  %v735_v13 = vpop.f32.mrb[30].mxu0  ;;  %v799_v14 = vpop.f32.mrb[30].mxu1 }
 0x13d   : > { %v1381_v61 = vpack.c.bf16 %v968_v55, %v968_v55  ;;  %v1366_v5 = vpack.c.bf16 %v953_v62, %v953_v62  ;;  %v899_v12 = vld [vmem:[#allocation2 + $0xe0] sm:$0xff]  ;;  %v922_v15 = vadd.f32 %v1700_v63, %v883_v11  ;;  %850 = vst.msk [vmem:[#allocation2 + $0x70] sm:$0xff] %vm272_vm0, %v817_v7  ;;  %866 = vst.msk [vmem:[#allocation2 + $0xf0] sm:$0xff] %vm272_vm0, %v833_v8  ;;  %v737_v19 = vpop.f32.mrb[31].mxu0  ;;  %v801_v20 = vpop.f32.mrb[31].mxu1 }
 0x13e   : > { %1113 = vst.msk [vmem:[%s1714_s22 + $0x28] sm:$0xf] %vm1102_vm3, %v1365_v60  ;;  %v1382_v6 = vpack.c.bf16 %v969_v0, %v969_v0  ;;  %v938_v16 = vadd.f32 %v1700_v63, %v899_v12  ;;  %v818_v17 = vadd.f32 %v735_v13, %v320_v3  ;;  %v834_v18 = vadd.f32 %v799_v14, %v336_v4 }
 0x13f   : > { %1129 = vst.msk [vmem:[%s1714_s22 + $0x68] sm:$0xf] %vm1102_vm3, %v1381_v61  ;;  %1114 = vst.msk [vmem:[%s1714_s22 + $0x2c] sm:$0xf] %vm1102_vm3, %v1366_v5  ;;  %v954_v23 = vmax.f32 %v922_v15, 0.0 }
 0x140   : > { %1130 = vst.msk [vmem:[%s1714_s22 + $0x6c] sm:$0xf] %vm1102_vm3, %v1382_v6  ;;  %v884_v21 = vld [vmem:[#allocation2 + $0x68] sm:$0xff]  ;;  %v970_v24 = vmax.f32 %v938_v16, 0.0 }
 0x141   : > { %v900_v22 = vld [vmem:[#allocation2 + $0xe8] sm:$0xff]  ;;  %v923_v25 = vadd.f32 %v1700_v63, %v884_v21  ;;  %851 = vst.msk [vmem:[#allocation2 + $0x78] sm:$0xff] %vm272_vm0, %v818_v17  ;;  %867 = vst.msk [vmem:[#allocation2 + $0xf8] sm:$0xff] %vm272_vm0, %v834_v18  ;;  %v1367_v27 = vpack.c.bf16 %v954_v23, %v954_v23 }
 0x142   : > { %v939_v26 = vadd.f32 %v1700_v63, %v900_v22  ;;  %v1383_v28 = vpack.c.bf16 %v970_v24, %v970_v24 }
 0x143   : > { %v955_v29 = vmax.f32 %v923_v25, 0.0  ;;  %1115 = vst.msk [vmem:[%s1714_s22 + $0x30] sm:$0xf] %vm1102_vm3, %v1367_v27 }
 0x144   : > { %v971_v30 = vmax.f32 %v939_v26, 0.0  ;;  %1131 = vst.msk [vmem:[%s1714_s22 + $0x70] sm:$0xf] %vm1102_vm3, %v1383_v28  ;;  %v885_v33 = vld [vmem:[#allocation2 + $0x70] sm:$0xff] }
 0x145   : > { %v1368_v31 = vpack.c.bf16 %v955_v29, %v955_v29  ;;  %v901_v34 = vld [vmem:[#allocation2 + $0xf0] sm:$0xff]  ;;  %v924_v35 = vadd.f32 %v1700_v63, %v885_v33 }
 0x146   : > { %v1384_v32 = vpack.c.bf16 %v971_v30, %v971_v30  ;;  %v940_v36 = vadd.f32 %v1700_v63, %v901_v34 }
 0x147   : > { %1116 = vst.msk [vmem:[%s1714_s22 + $0x34] sm:$0xf] %vm1102_vm3, %v1368_v31  ;;  %v956_v39 = vmax.f32 %v924_v35, 0.0 }
 0x148   : > { %1132 = vst.msk [vmem:[%s1714_s22 + $0x74] sm:$0xf] %vm1102_vm3, %v1384_v32  ;;  %v886_v37 = vld [vmem:[#allocation2 + $0x78] sm:$0xff]  ;;  %v972_v40 = vmax.f32 %v940_v36, 0.0 }
 0x149   : > { %v902_v38 = vld [vmem:[#allocation2 + $0xf8] sm:$0xff]  ;;  %v925_v41 = vadd.f32 %v1700_v63, %v886_v37  ;;  %v1369_v43 = vpack.c.bf16 %v956_v39, %v956_v39 }
 0x14a   : > { %v941_v42 = vadd.f32 %v1700_v63, %v902_v38  ;;  %v1385_v44 = vpack.c.bf16 %v972_v40, %v972_v40 }
 0x14b   : > { %v957_v45 = vmax.f32 %v925_v41, 0.0  ;;  %1117 = vst.msk [vmem:[%s1714_s22 + $0x38] sm:$0xf] %vm1102_vm3, %v1369_v43 }
 0x14c   : > { %v973_v46 = vmax.f32 %v941_v42, 0.0  ;;  %1133 = vst.msk [vmem:[%s1714_s22 + $0x78] sm:$0xf] %vm1102_vm3, %v1385_v44 }
 0x14d   : > { %v1370_v47 = vpack.c.bf16 %v957_v45, %v957_v45 }
 0x14e   : > { %v1386_v48 = vpack.c.bf16 %v973_v46, %v973_v46 }
 0x14f   : > { %1118 = vst.msk [vmem:[%s1714_s22 + $0x3c] sm:$0xf] %vm1102_vm3, %v1370_v47 }
 0x150   : > { %1134 = vst.msk [vmem:[%s1714_s22 + $0x7c] sm:$0xf] %vm1102_vm3, %v1386_v48 }
 0x151 PF: > { %s13_s14 = sadd.s32 1, %s1513_s14   ;;  %s1845_s12 = smov %s1509_s13 }
 0x152   : > { %p10_p5 = scmp.ge.s32.totalorder %s13_s14, 10   ;;  %s1846_s13 = smov %s1848_s15 }
 0x154   :  { %12 = sbr.rel (!%p10_p5) target bundleno = 2 (0x2), region = 76 }

</bundles_post_ra>
